<compile_context>
chip_gen: v6e
topology: v6e:2x2x1
jax: 0.10.0
libtpu: 0.0.40
codegen_flags: <defaults>
</compile_context>

<pallas_src>
import math
from functools import partial

import jax
import jax.numpy as jnp
from jax.experimental import pallas as pl
from jax.experimental.pallas import tpu as pltpu


def _round_up(x, m):
    return ((x + m - 1) // m) * m


def _siren_injection_kernel(x_ref, w_ref, b_ref, *o_refs):
    """One row tile of out = x @ W.T + b, written as n_layers chunk outputs.

    x_ref:      (tm, K_pad)           streamed row tile
    w_ref:      (n_layers, K_pad, C)  resident chunk-major weight stack
    b_ref:      (n_layers, 1, C)      resident chunk-major bias stack
    o_refs[j]:  (tm, C)               chunk-j output tile
    """
    x = x_ref[...]
    for j, o_ref in enumerate(o_refs):  # n_layers is static -> unrolled
        acc = jnp.dot(x, w_ref[j], preferred_element_type=jnp.float32)
        acc = acc + b_ref[j]
        # TODO(synk): if the consumer is SIREN's sin(omega * .) activation,
        # fuse it here (EUP slot is idle) and save a full HBM round-trip.
        o_ref[...] = acc.astype(o_ref.dtype)


@partial(jax.jit, static_argnames=("block_rows", "out_dtype"))
def siren_injection_chunks(x2d, w_stack, b_stack, *, block_rows=4096,
                           out_dtype=jnp.float32):
    """x2d: (M, K) f32, w_stack: (n_layers, K_pad, C), b_stack: (n_layers, 1, C).

    Returns a tuple of n_layers arrays of shape (m_pad, C) with m_pad >= M
    (balanced row tiling keeps m_pad - M < 8 * n_blocks).
    """
    M, K = x2d.shape
    n_layers, k_pad, C = w_stack.shape
    N = n_layers * C

    # Zero-pad the contraction dim so the MXU matmul lowers cleanly.
    if k_pad != K:
        x2d = jnp.pad(x2d, ((0, 0), (0, k_pad - K)))

    # Cap the row tile so the double-buffered working set (x tile + all chunk
    # output tiles) stays comfortably inside scoped VMEM on every generation.
    bytes_per_row = 4 * (k_pad + N) * 2          # double-buffered, f32
    vmem_cap_rows = max(8, (24 * 1024 * 1024 // bytes_per_row) // 8 * 8)
    eff_block_rows = max(8, min(block_rows, vmem_cap_rows))

    # Balanced row blocks: avoid M-overshoot, keep >= 2 blocks when possible
    # so the "parallel" axis can shard across both v7x TensorCores.
    n_blocks = max(pl.cdiv(M, eff_block_rows), 1)
    if n_blocks == 1 and M > 8:
        n_blocks = 2
    tm = _round_up(pl.cdiv(M, n_blocks), 8)
    n_blocks = pl.cdiv(M, tm)
    m_pad = tm * n_blocks
    if m_pad != M:
        x2d = jnp.pad(x2d, ((0, m_pad - M), (0, 0)))

    out_shapes = tuple(jax.ShapeDtypeStruct((m_pad, C), out_dtype)
                       for _ in range(n_layers))
    out_specs = tuple(pl.BlockSpec((tm, C), lambda i: (i, 0))
                      for _ in range(n_layers))

    outs = pl.pallas_call(
        _siren_injection_kernel,
        out_shape=out_shapes,
        grid_spec=pltpu.PrefetchScalarGridSpec(
            num_scalar_prefetch=0,
            grid=(n_blocks,),
            in_specs=[
                pl.BlockSpec((tm, k_pad), lambda i: (i, 0)),          # stream
                pl.BlockSpec((n_layers, k_pad, C), lambda i: (0, 0, 0)),  # resident
                pl.BlockSpec((n_layers, 1, C), lambda i: (0, 0, 0)),      # resident
            ],
            out_specs=out_specs,
        ),
        compiler_params=pltpu.CompilerParams(
            # Row tiles are independent -> shard across TensorCores.
            dimension_semantics=("parallel",),
            # v5e defaults to 16 MiB scoped VMEM; raise so big tiles fit on
            # all generations (64 MiB <= physical VMEM everywhere).
            vmem_limit_bytes=64 * 1024 * 1024,
        ),
    )(x2d, w_stack, b_stack)

    if not isinstance(outs, (tuple, list)):
        outs = (outs,)
    return tuple(outs)


class SIRENInjectionPallas:
    """JAX/Pallas port of SIRENInjection (Linear + chunk along last axis)."""

    def __init__(self, in_channels, interm_channels, scale=1.0, n_layers=1,
                 key=jax.random.PRNGKey(0), block_rows=4096,
                 min_pallas_rows=2048, out_dtype=jnp.float32):
        out_channels = interm_channels * n_layers
        self.in_channels = in_channels
        self.interm_channels = interm_channels
        self.n_layers = n_layers
        self.out_channels = out_channels
        self.block_rows = block_rows
        self.min_pallas_rows = min_pallas_rows
        self.out_dtype = out_dtype

        kw, kb = jax.random.split(key)
        # nn.Linear default init: U(-1/sqrt(in), 1/sqrt(in)), then weight *= scale
        bound = 1.0 / math.sqrt(in_channels)
        self.weight = (
            jax.random.uniform(kw, (out_channels, in_channels),
                               minval=-bound, maxval=bound, dtype=jnp.float32)
            * scale
        )
        # bias.uniform_(-pi, pi)
        self.bias = jax.random.uniform(
            kb, (out_channels,), minval=-math.pi, maxval=math.pi,
            dtype=jnp.float32
        )

        # Kernel-side cached layouts, built once at init:
        #   * contraction dim zero-padded to a multiple of 8 (MXU-friendly),
        #   * weight transposed and regrouped chunk-major: (n_layers, K_pad, C),
        #   * bias regrouped chunk-major: (n_layers, 1, C).
        k_pad = _round_up(in_channels, 8)
        w_t = self.weight.T                                  # (K, N)
        w_t = jnp.pad(w_t, ((0, k_pad - in_channels), (0, 0)))   # (K_pad, N)
        self._w_stack = jnp.transpose(
            w_t.reshape(k_pad, n_layers, interm_channels), (1, 0, 2))
        self._b_stack = self.bias.reshape(n_layers, 1, interm_channels)
        self._k_pad = k_pad

    def __call__(self, x):
        # x: (..., in_channels)
        lead_shape = x.shape[:-1]
        assert x.shape[-1] == self.in_channels
        x2d = x.reshape(-1, self.in_channels).astype(jnp.float32)
        M = x2d.shape[0]
        C = self.interm_channels

        if M < self.min_pallas_rows:
            # Tiny inputs: one fused XLA dot+bias beats per-step Pallas
            # overhead (~0.35 us/step plus DMA setup).
            out2d = (jnp.dot(x2d, self.weight.T) + self.bias).astype(self.out_dtype)
            chunks = [out2d[:, i * C:(i + 1) * C] for i in range(self.n_layers)]
        else:
            outs = siren_injection_chunks(
                x2d, self._w_stack, self._b_stack,
                block_rows=self.block_rows, out_dtype=self.out_dtype)
            # Each chunk comes out as its own contiguous (m_pad, C) array; only
            # slice when row padding was actually added (m_pad == M otherwise).
            chunks = [o if o.shape[0] == M else o[:M] for o in outs]

        # torch.chunk(n_layers, dim=-1) -> tuple of n_layers equal slices
        return tuple(c.reshape(*lead_shape, C) for c in chunks)


def _reference(x, weight, bias, n_layers):
    out = jnp.einsum("...k,nk->...n", x, weight) + bias
    return tuple(jnp.split(out, n_layers, axis=-1))


if __name__ == "__main__":
    key = jax.random.PRNGKey(0)
    k_x1, k_x2, k_mod = jax.random.split(key, 3)

    in_channels, interm_channels, n_layers, scale = 4, 32, 2, 1.0

    # min_pallas_rows=0 forces the Pallas path even at small M so the kernel
    # itself is exercised by this test.
    module = SIRENInjectionPallas(in_channels, interm_channels, scale=scale,
                                  n_layers=n_layers, key=k_mod,
                                  min_pallas_rows=0)

    # Small SIREN-style coordinate input: (batch=2, points=8, in_channels=4).
    # M = 16 rows -> 2 row blocks of 8 (grid exercised even at tiny M).
    x_small = jax.random.normal(k_x1, (2, 8, in_channels), dtype=jnp.float32)
    outs_small = jax.block_until_ready(module(x_small))
    refs_small = _reference(x_small, module.weight, module.bias, n_layers)
    assert len(outs_small) == n_layers
    for o, r in zip(outs_small, refs_small):
        assert o.shape == (2, 8, interm_channels), o.shape
        assert jnp.allclose(o, r, atol=1e-5, rtol=1e-5)

    # Moderate coordinate grid: M = 4096 rows -> 2 balanced 2048-row tiles
    # (one per TensorCore on v7x), weight/bias resident across iterations.
    x_med = jax.random.normal(k_x2, (4, 1024, in_channels), dtype=jnp.float32)
    outs_med = jax.block_until_ready(module(x_med))
    refs_med = _reference(x_med, module.weight, module.bias, n_layers)
    for o, r in zip(outs_med, refs_med):
        assert o.shape == (4, 1024, interm_channels), o.shape
        assert jnp.allclose(o, r, atol=1e-4, rtol=1e-4)

    print("KERNEL_OK")
</pallas_src>

<mosaic_0001>
module attributes {stable_mosaic.version = 11 : i64} {
  func.func @_siren_injection_kernel(%arg0: i32, %arg1: memref<8x8xf32, #tpu.memory_space<vmem>>, %arg2: memref<2x8x32xf32, #tpu.memory_space<vmem>>, %arg3: memref<2x1x32xf32, #tpu.memory_space<vmem>>, %arg4: memref<8x32xf32, #tpu.memory_space<vmem>>, %arg5: memref<8x32xf32, #tpu.memory_space<vmem>>) attributes {dimension_semantics = [#tpu.dimension_semantics<parallel>], iteration_bounds = array<i64: 2>, scalar_prefetch = 0 : i64, scratch_operands = 0 : i64, tpu.core_type = #tpu.core_type<tc>, window_params = [{transform_indices = @transform_0, window_bounds = array<i64: 8, 8>}, {pipeline_mode = #tpu.pipeline_mode<synchronous>, transform_indices = @transform_1, window_bounds = array<i64: 2, 8, 32>}, {pipeline_mode = #tpu.pipeline_mode<synchronous>, transform_indices = @transform_2, window_bounds = array<i64: 2, 1, 32>}, {transform_indices = @transform_3, window_bounds = array<i64: 8, 32>}, {transform_indices = @transform_4, window_bounds = array<i64: 8, 32>}]} {
    %c0 = arith.constant 0 : index
    %c0_0 = arith.constant 0 : index
    %0 = vector.load %arg1[%c0, %c0_0] : memref<8x8xf32, #tpu.memory_space<vmem>>, vector<8x8xf32>
    %c0_1 = arith.constant 0 : index
    %c0_2 = arith.constant 0 : index
    %c0_3 = arith.constant 0 : index
    %1 = vector.load %arg2[%c0_1, %c0_2, %c0_3] : memref<2x8x32xf32, #tpu.memory_space<vmem>>, vector<1x8x32xf32>
    %2 = vector.shape_cast %1 : vector<1x8x32xf32> to vector<8x32xf32>
    %cst = arith.constant dense<0.000000e+00> : vector<8x32xf32>
    %3 = tpu.matmul %0, %2, %cst {dimension_numbers = #tpu.dot_dimension_numbers<[1], [0], [0], [1], [0, 0, 1, 1], [], []>} : vector<8x8xf32>, vector<8x32xf32>, vector<8x32xf32> -> vector<8x32xf32>
    %c0_4 = arith.constant 0 : index
    %c0_5 = arith.constant 0 : index
    %c0_6 = arith.constant 0 : index
    %4 = vector.load %arg3[%c0_4, %c0_5, %c0_6] : memref<2x1x32xf32, #tpu.memory_space<vmem>>, vector<1x1x32xf32>
    %5 = vector.shape_cast %4 : vector<1x1x32xf32> to vector<1x32xf32>
    %6 = vector.broadcast %5 : vector<1x32xf32> to vector<8x32xf32>
    %7 = arith.addf %3, %6 : vector<8x32xf32>
    %c0_7 = arith.constant 0 : index
    %c0_8 = arith.constant 0 : index
    %8 = vector.load %arg4[%c0_7, %c0_8] : memref<8x32xf32, #tpu.memory_space<vmem>>, vector<8x32xf32>
    tpu.vector_store %arg4[%c0_7, %c0_8], %7 {strides = array<i32>} : memref<8x32xf32, #tpu.memory_space<vmem>>, vector<8x32xf32>,
    %c1 = arith.constant 1 : index
    %c0_9 = arith.constant 0 : index
    %c0_10 = arith.constant 0 : index
    %9 = vector.load %arg2[%c1, %c0_9, %c0_10] : memref<2x8x32xf32, #tpu.memory_space<vmem>>, vector<1x8x32xf32>
    %10 = vector.shape_cast %9 : vector<1x8x32xf32> to vector<8x32xf32>
    %cst_11 = arith.constant dense<0.000000e+00> : vector<8x32xf32>
    %11 = tpu.matmul %0, %10, %cst_11 {dimension_numbers = #tpu.dot_dimension_numbers<[1], [0], [0], [1], [0, 0, 1, 1], [], []>} : vector<8x8xf32>, vector<8x32xf32>, vector<8x32xf32> -> vector<8x32xf32>
    %c1_12 = arith.constant 1 : index
    %c0_13 = arith.constant 0 : index
    %c0_14 = arith.constant 0 : index
    %12 = vector.load %arg3[%c1_12, %c0_13, %c0_14] : memref<2x1x32xf32, #tpu.memory_space<vmem>>, vector<1x1x32xf32>
    %13 = vector.shape_cast %12 : vector<1x1x32xf32> to vector<1x32xf32>
    %14 = vector.broadcast %13 : vector<1x32xf32> to vector<8x32xf32>
    %15 = arith.addf %11, %14 : vector<8x32xf32>
    %c0_15 = arith.constant 0 : index
    %c0_16 = arith.constant 0 : index
    %16 = vector.load %arg5[%c0_15, %c0_16] : memref<8x32xf32, #tpu.memory_space<vmem>>, vector<8x32xf32>
    tpu.vector_store %arg5[%c0_15, %c0_16], %15 {strides = array<i32>} : memref<8x32xf32, #tpu.memory_space<vmem>>, vector<8x32xf32>,
    return
  }
  func.func @transform_0(%arg0: i32) -> (i32, i32) {
    %c0_i32 = arith.constant 0 : i32
    %c0_i32_0 = arith.constant 0 : i32
    return %arg0, %c0_i32 : i32, i32
  }
  func.func @transform_1(%arg0: i32) -> (i32, i32, i32) {
    %c0_i32 = arith.constant 0 : i32
    %c0_i32_0 = arith.constant 0 : i32
    %c0_i32_1 = arith.constant 0 : i32
    %c0_i32_2 = arith.constant 0 : i32
    return %c0_i32, %c0_i32_0, %c0_i32_1 : i32, i32, i32
  }
  func.func @transform_2(%arg0: i32) -> (i32, i32, i32) {
    %c0_i32 = arith.constant 0 : i32
    %c0_i32_0 = arith.constant 0 : i32
    %c0_i32_1 = arith.constant 0 : i32
    %c0_i32_2 = arith.constant 0 : i32
    return %c0_i32, %c0_i32_0, %c0_i32_1 : i32, i32, i32
  }
  func.func @transform_3(%arg0: i32) -> (i32, i32) {
    %c0_i32 = arith.constant 0 : i32
    %c0_i32_0 = arith.constant 0 : i32
    return %arg0, %c0_i32 : i32, i32
  }
  func.func @transform_4(%arg0: i32) -> (i32, i32) {
    %c0_i32 = arith.constant 0 : i32
    %c0_i32_0 = arith.constant 0 : i32
    return %arg0, %c0_i32 : i32, i32
  }
}

</mosaic_0001>

<bundles_post_ra>
// kernel: siren_injection_chunks.1
= control target key start
LH: loop header
LB: loop body
LE: loop exit
PB: predicated region body
PF: predicated region fallthrough
CT: control target
= control target key end

     0   :  { %10 = vsyncpa [#allocation3], 0  ;;  %s836_s0 = inlined_call_operand.vmem [shape: f32[16,8], index: 0, kind: input, shape index: {}]   ;;  %s837_s1 = inlined_call_operand.vmem [shape: f32[2,8,32], index: 1, kind: input, shape index: {}]   ;;  %s838_s2 = inlined_call_operand.vmem [shape: f32[2,1,32], index: 2, kind: input, shape index: {}]   ;;  %s839_s3 = inlined_call_operand.hbm [shape: f32[16,32], index: 3, kind: output, shape index: {0}]   ;;  %s840_s4 = inlined_call_operand.hbm [shape: f32[16,32], index: 4, kind: output, shape index: {1}]  }
   0x1   :  { %12 = vsyncpa [#allocation3 + $0x1], 0 }
   0x2   :  { %13 = vsyncpa [#allocation5], 0 }
   0x3   :  { %15 = vsyncpa [#allocation5 + $0x1], 0  ;;  %s693_s15 = smov 0   ;;  %s695_s16 = smov 0  }
   0x4   :  { %s697_s17 = smov 0   ;;  %s699_s18 = smov 0  }
   0x5 LB: > { %s714_s19 = sadd.s32 4294967295, %s662_s18   ;;  %s493_s20 = sadd.s32 4294967294, %s662_s18   ;;  %s662_s18 = sphi %s699_s18, %s846_s18   ;;  %s658_s17 = sphi %s697_s17, %s845_s17   ;;  %s654_s16 = sphi %s695_s16, %s844_s16   ;;  %s650_s15 = sphi %s693_s15, %s843_s15  }
   0x6   : > { %s718_s21 = sadd.s32 1, %s662_s18   ;;  %s96_s22 = sadd.s32 1, %s658_s17 }
   0x7   : > { %s93_s23 = ssub.s32 %s662_s18, %s718_s21  ;;  %p106_p0 = scmp.ne.s32.totalorder %s658_s17, %s654_s16 }
   0x8   : > { %p94_p1 = scmp.eq.s32.totalorder %s93_s23, 0  ;;  %p107_p2 = scmp.eq.s32.totalorder %s714_s19, 1 }
   0x9   : > { %p112_p3 = scmp.ne.s32.totalorder %s654_s16, %s650_s15  ;;  %p113_p4 = scmp.eq.s32.totalorder %s493_s20, 1 }
   0xa   : > { %s729_s24 = scalar_select %p94_p1, %s658_s17, %s96_s22  }
   0xb   : > { %p731_p5 = por %p107_p2, %p106_p0  ;;  %p735_p6 = por %p113_p4, %p112_p3 }
   0xc   : > { %p496_p7 = scmp.ge.s32.totalorder %s662_s18, 1  ;;  %p170_p8 = scmp.lt.s32.totalorder %s662_s18, 3 }
   0xe   : > { %p171_p9 = pnand %p496_p7, %p170_p8 }
   0xf   : > { %p200_p10 = scmp.lt.s32.totalorder (!%p171_p9), %s714_s19, 1  ;;  %s753_s10 = sand.u32 (!%p171_p9), 1, %s654_s16  }
  0x10   : > { %174 = sbr.rel (%p171_p9) target bundleno = 256 (0x100), region = 32  ;;  %s497_s11 = sshll.u32 (!%p171_p9), %s753_s10, 3 }
  0x11   : > { %s508_s12 = sshll.u32 (!%p171_p9), %s714_s19, 7  ;;  %s192_s23 = scalar_lea.vmem (!%p171_p9), [#allocation2], %s497_s11 }
  0x12   : > { %s389_s27 = sshll.u32 (!%p171_p9), %s192_s23, 4  ;;  %s199_s28 = scalar_lea.vmem (!%p171_p9), [#allocation4], %s497_s11  ;;  %s768_s27 = int_to_ptr.vmem [resolvable:$true] %s389_s27 }
  0x13   : > { %s402_s29 = sshll.u32 (!%p171_p9), %s199_s28, 4  ;;  %s773_s8 = scalar_lea.hbm (!%p171_p9), %s840_s4, %s508_s12  ;;  %s775_s29 = int_to_ptr.vmem [resolvable:$true] %s402_s29 }
  0x14   : > { %s572_s11 = scalar_lea.vmem (!%p171_p9), %s768_s27, 128  ;;  %s666_s13 = smov (!%p171_p9), [#allocation2]  }
  0x15   : > { %v205_v0 = vld [vmem:[%s837_s1] sm:$0xff]  ;;  %v502_v1 = vld [vmem:[%s837_s1 + $0x8] sm:$0xff]  ;;  %v664_v2 = vmov 0.0   ;;  %vm665_vm0 = vmmov 0   ;;  %s201_s5 = scalar_select %p200_p10, %s714_s19, 1  ;;  %vm213_vm1 = vcmask 64512  }
  0x16   : > { %516 = vmatprep.subr.mxu0 %v664_v2  ;;  %521 = vmatprep.subr.mxu1 %v664_v2  ;;  %v500_v4 = vld [vmem:[%s838_s2] ss:$0 sm:$0xff]  ;;  %v504_v5 = vld [vmem:[%s838_s2 + $0x1] ss:$0 sm:$0xff]  ;;  %vm287_vm2 = vcmask 261120   ;;  %s766_s19 = scalar_lea.hbm %s839_s3, %s508_s12  ;;  %p573_p11 = scmp.ne.s32.totalorder %s768_s27, %s572_s11 }
  0x17   : > { %517 = vmatpush3.msra.mxu0 %v205_v0  ;;  %518 = vmatprep.mubr.msk.f32.mxu0 %vm665_vm0, %v664_v2  ;;  %s499_s6 = sshll.u32 %s201_s5, 3  ;;  %s576_s14 = sshll.u32 %s666_s13, 4  ;;  %s577_s14 = int_to_ptr.vmem [resolvable:$false] %s576_s14 }
  0x18   : > { %522 = vmatpush3.msra.mxu1 %v502_v1  ;;  %523 = vmatprep.mubr.msk.f32.mxu1 %vm665_vm0, %v664_v2  ;;  %s203_s9 = scalar_lea.vmem %s836_s0, %s499_s6  ;;  %p574_p12 = pnand %p573_p11, %p731_p5 }
  0x19   : > { %v204_v3 = vld [vmem:[%s203_s9] sm:$0xff]  ;;  %s371_s9 = scalar_lea.sflag [#allocation3], %s753_s10  ;;  %s578_s20 = scalar_lea.vmem %s577_s14, 256 }
  0x1a   : > { %519 = vmatmul.mubr.msk.f32.vlgmr.msra.gmra.mxu0 %vm213_vm1, %v204_v3  ;;  %524 = vmatmul.mubr.msk.f32.vlgmr.msra.gmra.mxu1 %vm213_vm1, %v204_v3  ;;  %p575_p13 = pneg %p574_p12  ;;  %p579_p0 = scmp.lt.s32.totalorder %s768_s27, %s577_s14 }
  0x1b   : > { %p580_p1 = scmp.lt.s32.totalorder %s578_s20, %s572_s11 }
  0x1d   : > { %p581_p2 = por %p580_p1, %p579_p0 }
  0x1f   : > { %p582_p3 = pnand %p581_p2, %p575_p13 }
  0xda   : > { %v283_v6 = vpop.f32.mrf.mxu0  ;;  %v365_v7 = vpop.f32.mrf.mxu1 }
  0xdb   : > { %v284_v8 = vadd.f32 %v500_v4, %v283_v6  ;;  %v366_v9 = vadd.f32 %v504_v5, %v365_v7 }
  0xdc   : > { %v520_v10 = vpop.f32.mrf.mxu0  ;;  %v525_v11 = vpop.f32.mrf.mxu1 }
  0xdd   : > { %288 = vst.msk [vmem:[%s192_s23] sm:$0xff] %vm287_vm2, %v284_v8  ;;  %369 = vst.msk [vmem:[%s199_s28] sm:$0xff] %vm287_vm2, %v366_v9 }
  0xde   : > { %585 = shalt.err (!%p582_p3)
}
  0xdf   : > { %s586_s12 = scalar_lea.hbm %s766_s19, 128  ;;  %s590_s28 = scalar_lea.hbm %s839_s3, 256 }
  0xe0   : > { %p587_p4 = scmp.ne.s32.totalorder %s766_s19, %s586_s12  ;;  %p591_p9 = scmp.lt.s32.totalorder %s766_s19, %s839_s3 }
  0xe1   : > { %p592_p10 = scmp.lt.s32.totalorder %s590_s28, %s586_s12 }
  0xe2   : > { %p588_p7 = pnand %p587_p4, %p731_p5 }
  0xe3   : > { %p593_p11 = por %p592_p10, %p591_p9 }
  0xe4   : > { %p589_p8 = pneg %p588_p7 }
  0xe6   : > { %p594_p12 = pnand %p593_p11, %p589_p8 }
  0xe8   : > { %597 = shalt.err (!%p594_p12)
}
  0xe9   : > { %526 = dma.vmem_to_hbm [thread:$0]  (%p731_p5), %s768_s27, 128, %s766_s19, %s371_s9  }
  0xea   : > { %s376_s6 = scalar_lea.sflag [#allocation5], %s753_s10  ;;  %s598_s7 = scalar_lea.vmem %s775_s29, 128 }
  0xeb   : > { %p599_p13 = scmp.ne.s32.totalorder %s775_s29, %s598_s7  ;;  %s667_s11 = smov [#allocation4]  }
  0xec   : > { %s602_s13 = sshll.u32 %s667_s11, 4  ;;  %s603_s13 = int_to_ptr.vmem [resolvable:$false] %s602_s13 }
  0xed   : > { %p600_p0 = pnand %p599_p13, %p731_p5  ;;  %s604_s14 = scalar_lea.vmem %s603_s13, 256 }
  0xee   : > { %p605_p2 = scmp.lt.s32.totalorder %s775_s29, %s603_s13  ;;  %p606_p3 = scmp.lt.s32.totalorder %s604_s14, %s598_s7 }
  0xef   : > { %p601_p1 = pneg %p600_p0 }
  0xf0   : > { %p607_p4 = por %p606_p3, %p605_p2 }
  0xf2   : > { %p608_p7 = pnand %p607_p4, %p601_p1 }
  0xf4   : > { %611 = shalt.err (!%p608_p7)
}
  0xf5   : > { %s612_s27 = scalar_lea.hbm %s773_s8, 128  ;;  %s616_s9 = scalar_lea.hbm %s840_s4, 256 }
  0xf6   : > { %p613_p8 = scmp.ne.s32.totalorder %s773_s8, %s612_s27  ;;  %p617_p11 = scmp.lt.s32.totalorder %s773_s8, %s840_s4 }
  0xf7   : > { %p618_p12 = scmp.lt.s32.totalorder %s616_s9, %s612_s27 }
  0xf8   : > { %p614_p9 = pnand %p613_p8, %p731_p5 }
  0xf9   : > { %p619_p13 = por %p618_p12, %p617_p11 }
  0xfa   : > { %p615_p10 = pneg %p614_p9 }
  0xfc   : > { %p620_p0 = pnand %p619_p13, %p615_p10 }
  0xfe   : > { %623 = shalt.err (!%p620_p0)
}
  0xff   : > { %527 = dma.vmem_to_hbm [thread:$0]  (%p731_p5), %s775_s29, 128, %s773_s8, %s376_s6  }
 0x100 PF: > { %p537_p1 = scmp.ge.s32.totalorder %s662_s18, 2  ;;  %s414_s22 = sand.u32 1, %s650_s15  }
 0x101   : > { %s415_s23 = scalar_lea.sflag [#allocation3], %s414_s22 }
 0x102   : > { %p531_p2 = pnand %p537_p1, %p735_p6 }
 0x104   : > { %p532_p3 = pneg %p531_p2 }
 0x106   : > { %641 = dma.done.wait (%p532_p3), %s415_s23, 128  }
 0x107   : > { %643 = vsyncadd (%p532_p3), %s415_s23, 4294967168  ;;  %s424_s28 = scalar_lea.sflag [#allocation5], %s414_s22 }
 0x108   : > { %645 = dma.done.wait (%p532_p3), %s424_s28, 128  }
 0x109   : > { %647 = vsyncadd (%p532_p3), %s424_s28, 4294967168  ;;  %p18_p5 = scmp.ge.s32.totalorder %s718_s21, 4   ;;  %s843_s15 = smov %s654_s16 }
 0x10a   : > { %s844_s16 = smov %s658_s17  ;;  %s845_s17 = smov %s729_s24 }
 0x10b   : > { %s846_s18 = smov %s718_s21  ;;  %20 = sbr.rel (!%p18_p5) target bundleno = 5 (0x5), region = 86 }
 0x110   :  { %429 = vsyncpa [#allocation3], 1 }
 0x111   :  { %431 = vsyncpa [#allocation3 + $0x1], 1 }
 0x112   :  { %432 = vsyncpa [#allocation5], 1 }
 0x113   :  { %434 = vsyncpa [#allocation5 + $0x1], 1 }

</bundles_post_ra>
